<compile_context>
chip_gen: v5e
topology: v5e:2x2
jax: 0.10.0
libtpu: 0.0.40
codegen_flags: <defaults>
</compile_context>

<pallas_src>
import functools

import jax
import jax.numpy as jnp
from jax.experimental import pallas as pl
from jax.experimental.pallas import tpu as pltpu

EPS = 1e-5
ALIGN = 16  # bf16 sublane-packing tile height: keep every slab region 16-row aligned

# Row indices inside the packed (9, H) f32 per-feature parameter array.
_BN1_G, _BN1_B, _LN1_G, _LN1_B, _BN2_G, _BN2_B, _LN2_G, _LN2_B, _B3 = range(9)


def _round_up(n, m):
    return (n + m - 1) // m * m


def _bn(h, gamma, beta):
    """BatchNorm1d (training mode): stats over the batch axis, biased variance.

    Single-pass statistics + folded affine: scale/shift are computed on (1, H)
    tensors, so the full (B, H) tensor only sees one mul and one add.
    """
    mu = jnp.mean(h, axis=0, keepdims=True)
    ex2 = jnp.mean(h * h, axis=0, keepdims=True)
    var = jnp.maximum(ex2 - mu * mu, 0.0)
    scale = jax.lax.rsqrt(var + EPS) * gamma          # (1, H)
    shift = beta - mu * scale                         # (1, H)
    return h * scale + shift


def _ln(h, gamma, beta):
    """LayerNorm over the last axis, biased variance, single-pass statistics."""
    mu = jnp.mean(h, axis=-1, keepdims=True)
    ex2 = jnp.mean(h * h, axis=-1, keepdims=True)
    var = jnp.maximum(ex2 - mu * mu, 0.0)
    return (h - mu) * jax.lax.rsqrt(var + EPS) * gamma + beta


def actor_kernel(x_ref, wslab_ref, pvec_ref, out_ref, *,
                 state_dim, hidden, action_dim, w2_row0, w3_row0):
    # --- layer 1: fc1 -> bn1 -> ln1 -> relu ---
    # fc1 bias omitted: exactly cancelled by bn1's batch-mean subtraction.
    x16 = x_ref[...].astype(jnp.bfloat16)
    w1 = wslab_ref[0:state_dim, :]                                   # (S, H) bf16
    h = jnp.dot(x16, w1, preferred_element_type=jnp.float32)
    h = _bn(h, pvec_ref[_BN1_G:_BN1_G + 1, :], pvec_ref[_BN1_B:_BN1_B + 1, :])
    h = _ln(h, pvec_ref[_LN1_G:_LN1_G + 1, :], pvec_ref[_LN1_B:_LN1_B + 1, :])
    h = jnp.maximum(h, 0.0)

    # --- layer 2: fc2 -> bn2 -> ln2 -> relu ---
    # fc2 bias omitted: exactly cancelled by bn2's batch-mean subtraction.
    w2 = wslab_ref[w2_row0:w2_row0 + hidden, :]                      # (H, H) bf16
    h = jnp.dot(h.astype(jnp.bfloat16), w2, preferred_element_type=jnp.float32)
    h = _bn(h, pvec_ref[_BN2_G:_BN2_G + 1, :], pvec_ref[_BN2_B:_BN2_B + 1, :])
    h = _ln(h, pvec_ref[_LN2_G:_LN2_G + 1, :], pvec_ref[_LN2_B:_LN2_B + 1, :])
    h = jnp.maximum(h, 0.0)

    # --- output layer: fc3 -> relu ---
    # fc3 weight lives transposed in the slab as (action_dim, H); the matmul is tiny
    # (B x H x action_dim), so keep it in f32 for full output precision.
    w3 = wslab_ref[w3_row0:w3_row0 + action_dim, :].astype(jnp.float32)  # (A, H)
    b3 = pvec_ref[_B3:_B3 + 1, 0:action_dim]                             # (1, A)
    a = jnp.dot(h, w3.T, preferred_element_type=jnp.float32) + b3
    out_ref[...] = jnp.maximum(a, 0.0)


def pack_actor_params(p):
    """One-time packing (outside the hot path) into the kernel's argument layout.

    Returns:
      wslab: bf16 (Rtot, H) slab = [w1 (S rows) | w2 (H rows) | w3^T (A rows)],
             each region padded with zero rows to a 16-row boundary.
      pvec:  f32 (9, H) = [bn1_g, bn1_b, ln1_g, ln1_b, bn2_g, bn2_b, ln2_g, ln2_b,
             b3 (first action_dim columns, rest zero)].
    fc1/fc2 biases are intentionally not packed (training-mode BN cancels them).
    """
    w1, w2, w3 = p["w1"], p["w2"], p["w3"]
    S, H = w1.shape
    A = w3.shape[1]
    assert w2.shape == (H, H) and w3.shape[0] == H and A <= H

    r1 = _round_up(S, ALIGN)
    r2 = _round_up(H, ALIGN)
    r3 = _round_up(A, ALIGN)
    slab = jnp.zeros((r1 + r2 + r3, H), jnp.bfloat16)
    slab = slab.at[0:S, :].set(w1.astype(jnp.bfloat16))
    slab = slab.at[r1:r1 + H, :].set(w2.astype(jnp.bfloat16))
    slab = slab.at[r1 + r2:r1 + r2 + A, :].set(w3.T.astype(jnp.bfloat16))

    b3row = jnp.zeros((1, H), jnp.float32).at[0, :A].set(p["b3"][0])
    pvec = jnp.concatenate(
        [p["bn1_g"], p["bn1_b"], p["ln1_g"], p["ln1_b"],
         p["bn2_g"], p["bn2_b"], p["ln2_g"], p["ln2_b"], b3row],
        axis=0,
    ).astype(jnp.float32)  # (9, H)

    return {"wslab": slab, "pvec": pvec,
            "state_dim": S, "hidden": H, "action_dim": A,
            "w2_row0": r1, "w3_row0": r1 + r2}


def actor_forward(state, packed):
    B = state.shape[0]
    A = packed["action_dim"]
    kern = functools.partial(
        actor_kernel,
        state_dim=packed["state_dim"], hidden=packed["hidden"], action_dim=A,
        w2_row0=packed["w2_row0"], w3_row0=packed["w3_row0"])

    vmem = pl.BlockSpec(memory_space=pltpu.MemorySpace.VMEM)
    # Whole batch in one invocation (no grid): keeps BN batch statistics exact and
    # the <0.5 MiB working set trivially fits VMEM on v5e/v6e/v7x.
    return pl.pallas_call(
        kern,
        out_shape=jax.ShapeDtypeStruct((B, A), jnp.float32),
        in_specs=[vmem, vmem, vmem],
        out_specs=vmem,
    )(state, packed["wslab"], packed["pvec"])


def init_actor_params(key, state_dim, action_dim, h1=300, h2=300):
    """Init mirroring the PyTorch module's shapes.

    fc weights: Xavier-uniform, stored as (in, out).
    fc biases:  U(-1/sqrt(fan_in), 1/sqrt(fan_in)) (PyTorch Linear default).
    BN/LN affine params: perturbed around (1, 0) so the correctness check actually
    exercises the packed-parameter routing (forward semantics identical).
    """
    def xavier(k, fan_in, fan_out):
        bound = jnp.sqrt(6.0 / (fan_in + fan_out))
        return jax.random.uniform(k, (fan_in, fan_out), jnp.float32, -bound, bound)

    def bias(k, fan_in, fan_out):
        bound = 1.0 / jnp.sqrt(fan_in)
        return jax.random.uniform(k, (1, fan_out), jnp.float32, -bound, bound)

    ks = jax.random.split(key, 14)
    return {
        "w1": xavier(ks[0], state_dim, h1), "b1": bias(ks[1], state_dim, h1),
        "w2": xavier(ks[2], h1, h2),        "b2": bias(ks[3], h1, h2),
        "w3": xavier(ks[4], h2, action_dim), "b3": bias(ks[5], h2, action_dim),
        "bn1_g": 1.0 + 0.1 * jax.random.normal(ks[6], (1, h1), jnp.float32),
        "bn1_b": 0.1 * jax.random.normal(ks[7], (1, h1), jnp.float32),
        "ln1_g": 1.0 + 0.1 * jax.random.normal(ks[8], (1, h1), jnp.float32),
        "ln1_b": 0.1 * jax.random.normal(ks[9], (1, h1), jnp.float32),
        "bn2_g": 1.0 + 0.1 * jax.random.normal(ks[10], (1, h2), jnp.float32),
        "bn2_b": 0.1 * jax.random.normal(ks[11], (1, h2), jnp.float32),
        "ln2_g": 1.0 + 0.1 * jax.random.normal(ks[12], (1, h2), jnp.float32),
        "ln2_b": 0.1 * jax.random.normal(ks[13], (1, h2), jnp.float32),
    }


# ---------------------------------------------------------------------------
# Pure-JAX references for correctness checking.
# ---------------------------------------------------------------------------

def _bn_ref(h, g, b):  # two-pass batch stats, biased variance
    mu = jnp.mean(h, axis=0, keepdims=True)
    var = jnp.mean((h - mu) ** 2, axis=0, keepdims=True)
    return (h - mu) * jax.lax.rsqrt(var + EPS) * g + b


def _ln_ref(h, g, b):  # two-pass layer stats, biased variance
    mu = jnp.mean(h, axis=-1, keepdims=True)
    var = jnp.mean((h - mu) ** 2, axis=-1, keepdims=True)
    return (h - mu) * jax.lax.rsqrt(var + EPS) * g + b


def actor_reference_f32(state, p):
    """Exact PyTorch semantics, full f32 matmuls (incl. fc1/fc2 biases)."""
    hi = jax.lax.Precision.HIGHEST
    h = jnp.dot(state, p["w1"], precision=hi) + p["b1"]
    h = jnp.maximum(_ln_ref(_bn_ref(h, p["bn1_g"], p["bn1_b"]), p["ln1_g"], p["ln1_b"]), 0.0)
    h = jnp.dot(h, p["w2"], precision=hi) + p["b2"]
    h = jnp.maximum(_ln_ref(_bn_ref(h, p["bn2_g"], p["bn2_b"]), p["ln2_g"], p["ln2_b"]), 0.0)
    return jnp.maximum(jnp.dot(h, p["w3"], precision=hi) + p["b3"], 0.0)


def actor_reference_matched(state, p):
    """Same bf16 weight/activation quantization points as the kernel, but with the
    straightforward two-pass statistics and explicit biases -- verifies the kernel's
    algebraic shortcuts (bias cancellation, single-pass var, scale/shift fold)."""
    bf = lambda t: t.astype(jnp.bfloat16)
    hi = jax.lax.Precision.HIGHEST
    h = jnp.dot(bf(state), bf(p["w1"]), preferred_element_type=jnp.float32) + p["b1"]
    h = jnp.maximum(_ln_ref(_bn_ref(h, p["bn1_g"], p["bn1_b"]), p["ln1_g"], p["ln1_b"]), 0.0)
    h = jnp.dot(bf(h), bf(p["w2"]), preferred_element_type=jnp.float32) + p["b2"]
    h = jnp.maximum(_ln_ref(_bn_ref(h, p["bn2_g"], p["bn2_b"]), p["ln2_g"], p["ln2_b"]), 0.0)
    w3q = bf(p["w3"]).astype(jnp.float32)
    return jnp.maximum(jnp.dot(h, w3q, precision=hi) + p["b3"], 0.0)


if __name__ == "__main__":
    B, STATE_DIM, ACTION_DIM = 8, 32, 8

    key = jax.random.PRNGKey(0)
    k_param, k_state = jax.random.split(key)
    params = init_actor_params(k_param, STATE_DIM, ACTION_DIM)
    state = jax.random.normal(k_state, (B, STATE_DIM), jnp.float32)

    packed = pack_actor_params(params)          # one-time packing (outside hot path)
    out = actor_forward(state, packed)
    jax.block_until_ready(out)
    assert out.shape == (B, ACTION_DIM)

    # Tight check: kernel math vs a reference with identical bf16 quantization points.
    ref_m = actor_reference_matched(state, params)
    assert jnp.allclose(out, ref_m, atol=5e-4, rtol=5e-4), \
        "kernel mismatch vs bf16-matched JAX reference"

    # Loose check: bf16 weight approximation stays close to full-f32 PyTorch semantics.
    ref_f = actor_reference_f32(state, params)
    assert jnp.allclose(out, ref_f, atol=5e-2, rtol=5e-2), \
        "bf16-weight approximation diverged from f32 reference"

    print("KERNEL_OK")
</pallas_src>

<mosaic_0001>
module attributes {stable_mosaic.version = 11 : i64} {
  func.func @actor_kernel(%arg0: memref<8x32xf32, #tpu.memory_space<vmem>>, %arg1: memref<352x300xbf16, #tpu.memory_space<vmem>>, %arg2: memref<9x300xf32, #tpu.memory_space<vmem>>, %arg3: memref<8x8xf32, #tpu.memory_space<vmem>>) attributes {dimension_semantics = [], scalar_prefetch = 0 : i64, scratch_operands = 0 : i64, tpu.core_type = #tpu.core_type<tc>} {
    %c0 = arith.constant 0 : index
    %c0_0 = arith.constant 0 : index
    %0 = vector.load %arg0[%c0, %c0_0] : memref<8x32xf32, #tpu.memory_space<vmem>>, vector<8x32xf32>
    %1 = arith.truncf %0 : vector<8x32xf32> to vector<8x32xbf16>
    %c0_1 = arith.constant 0 : index
    %c0_2 = arith.constant 0 : index
    %2 = vector.load %arg1[%c0_1, %c0_2] : memref<352x300xbf16, #tpu.memory_space<vmem>>, vector<32x300xbf16>
    %cst = arith.constant dense<0.000000e+00> : vector<8x300xf32>
    %3 = tpu.matmul %1, %2, %cst {dimension_numbers = #tpu.dot_dimension_numbers<[1], [0], [0], [1], [0, 0, 1, 1], [], []>} : vector<8x32xbf16>, vector<32x300xbf16>, vector<8x300xf32> -> vector<8x300xf32>
    %c0_3 = arith.constant 0 : index
    %c0_4 = arith.constant 0 : index
    %4 = vector.load %arg2[%c0_3, %c0_4] : memref<9x300xf32, #tpu.memory_space<vmem>>, vector<1x300xf32>
    %c1 = arith.constant 1 : index
    %c0_5 = arith.constant 0 : index
    %5 = vector.load %arg2[%c1, %c0_5] : memref<9x300xf32, #tpu.memory_space<vmem>>, vector<1x300xf32>
    %cst_6 = arith.constant dense<0.000000e+00> : vector<300xf32>
    %6 = vector.multi_reduction <add>, %3, %cst_6 [0] : vector<8x300xf32> to vector<300xf32>
    %7 = vector.shape_cast %6 : vector<300xf32> to vector<1x300xf32>
    %cst_7 = arith.constant 8.000000e+00 : f32
    %8 = vector.broadcast %cst_7 : f32 to vector<1x300xf32>
    %9 = arith.divf %7, %8 : vector<1x300xf32>
    %10 = arith.mulf %3, %3 : vector<8x300xf32>
    %cst_8 = arith.constant dense<0.000000e+00> : vector<300xf32>
    %11 = vector.multi_reduction <add>, %10, %cst_8 [0] : vector<8x300xf32> to vector<300xf32>
    %12 = vector.shape_cast %11 : vector<300xf32> to vector<1x300xf32>
    %cst_9 = arith.constant 8.000000e+00 : f32
    %13 = vector.broadcast %cst_9 : f32 to vector<1x300xf32>
    %14 = arith.divf %12, %13 : vector<1x300xf32>
    %15 = arith.mulf %9, %9 : vector<1x300xf32>
    %16 = arith.subf %14, %15 : vector<1x300xf32>
    %cst_10 = arith.constant 0.000000e+00 : f32
    %17 = vector.broadcast %cst_10 : f32 to vector<1x300xf32>
    %18 = arith.maximumf %16, %17 : vector<1x300xf32>
    %cst_11 = arith.constant 9.99999974E-6 : f32
    %19 = vector.broadcast %cst_11 : f32 to vector<1x300xf32>
    %20 = arith.addf %18, %19 : vector<1x300xf32>
    %21 = math.rsqrt %20 : vector<1x300xf32>
    %22 = arith.mulf %21, %4 : vector<1x300xf32>
    %23 = arith.mulf %9, %22 : vector<1x300xf32>
    %24 = arith.subf %5, %23 : vector<1x300xf32>
    %25 = vector.broadcast %22 : vector<1x300xf32> to vector<8x300xf32>
    %26 = arith.mulf %3, %25 : vector<8x300xf32>
    %27 = vector.broadcast %24 : vector<1x300xf32> to vector<8x300xf32>
    %28 = arith.addf %26, %27 : vector<8x300xf32>
    %c2 = arith.constant 2 : index
    %c0_12 = arith.constant 0 : index
    %29 = vector.load %arg2[%c2, %c0_12] : memref<9x300xf32, #tpu.memory_space<vmem>>, vector<1x300xf32>
    %c3 = arith.constant 3 : index
    %c0_13 = arith.constant 0 : index
    %30 = vector.load %arg2[%c3, %c0_13] : memref<9x300xf32, #tpu.memory_space<vmem>>, vector<1x300xf32>
    %cst_14 = arith.constant dense<0.000000e+00> : vector<8xf32>
    %31 = vector.multi_reduction <add>, %28, %cst_14 [1] : vector<8x300xf32> to vector<8xf32>
    %32 = vector.shape_cast %31 : vector<8xf32> to vector<8x1xf32>
    %cst_15 = arith.constant 3.000000e+02 : f32
    %33 = vector.broadcast %cst_15 : f32 to vector<8x1xf32>
    %34 = arith.divf %32, %33 : vector<8x1xf32>
    %35 = arith.mulf %28, %28 : vector<8x300xf32>
    %cst_16 = arith.constant dense<0.000000e+00> : vector<8xf32>
    %36 = vector.multi_reduction <add>, %35, %cst_16 [1] : vector<8x300xf32> to vector<8xf32>
    %37 = vector.shape_cast %36 : vector<8xf32> to vector<8x1xf32>
    %cst_17 = arith.constant 3.000000e+02 : f32
    %38 = vector.broadcast %cst_17 : f32 to vector<8x1xf32>
    %39 = arith.divf %37, %38 : vector<8x1xf32>
    %40 = arith.mulf %34, %34 : vector<8x1xf32>
    %41 = arith.subf %39, %40 : vector<8x1xf32>
    %cst_18 = arith.constant 0.000000e+00 : f32
    %42 = vector.broadcast %cst_18 : f32 to vector<8x1xf32>
    %43 = arith.maximumf %41, %42 : vector<8x1xf32>
    %44 = vector.broadcast %34 : vector<8x1xf32> to vector<8x300xf32>
    %45 = arith.subf %28, %44 : vector<8x300xf32>
    %cst_19 = arith.constant 9.99999974E-6 : f32
    %46 = vector.broadcast %cst_19 : f32 to vector<8x1xf32>
    %47 = arith.addf %43, %46 : vector<8x1xf32>
    %48 = math.rsqrt %47 : vector<8x1xf32>
    %49 = vector.broadcast %48 : vector<8x1xf32> to vector<8x300xf32>
    %50 = arith.mulf %45, %49 : vector<8x300xf32>
    %51 = vector.broadcast %29 : vector<1x300xf32> to vector<8x300xf32>
    %52 = arith.mulf %50, %51 : vector<8x300xf32>
    %53 = vector.broadcast %30 : vector<1x300xf32> to vector<8x300xf32>
    %54 = arith.addf %52, %53 : vector<8x300xf32>
    %cst_20 = arith.constant 0.000000e+00 : f32
    %55 = vector.broadcast %cst_20 : f32 to vector<8x300xf32>
    %56 = arith.maximumf %54, %55 : vector<8x300xf32>
    %c32 = arith.constant 32 : index
    %c0_21 = arith.constant 0 : index
    %57 = vector.load %arg1[%c32, %c0_21] : memref<352x300xbf16, #tpu.memory_space<vmem>>, vector<300x300xbf16>
    %58 = arith.truncf %56 : vector<8x300xf32> to vector<8x300xbf16>
    %cst_22 = arith.constant dense<0.000000e+00> : vector<8x300xf32>
    %59 = tpu.matmul %58, %57, %cst_22 {dimension_numbers = #tpu.dot_dimension_numbers<[1], [0], [0], [1], [0, 0, 1, 1], [], []>} : vector<8x300xbf16>, vector<300x300xbf16>, vector<8x300xf32> -> vector<8x300xf32>
    %c4 = arith.constant 4 : index
    %c0_23 = arith.constant 0 : index
    %60 = vector.load %arg2[%c4, %c0_23] : memref<9x300xf32, #tpu.memory_space<vmem>>, vector<1x300xf32>
    %c5 = arith.constant 5 : index
    %c0_24 = arith.constant 0 : index
    %61 = vector.load %arg2[%c5, %c0_24] : memref<9x300xf32, #tpu.memory_space<vmem>>, vector<1x300xf32>
    %cst_25 = arith.constant dense<0.000000e+00> : vector<300xf32>
    %62 = vector.multi_reduction <add>, %59, %cst_25 [0] : vector<8x300xf32> to vector<300xf32>
    %63 = vector.shape_cast %62 : vector<300xf32> to vector<1x300xf32>
    %cst_26 = arith.constant 8.000000e+00 : f32
    %64 = vector.broadcast %cst_26 : f32 to vector<1x300xf32>
    %65 = arith.divf %63, %64 : vector<1x300xf32>
    %66 = arith.mulf %59, %59 : vector<8x300xf32>
    %cst_27 = arith.constant dense<0.000000e+00> : vector<300xf32>
    %67 = vector.multi_reduction <add>, %66, %cst_27 [0] : vector<8x300xf32> to vector<300xf32>
    %68 = vector.shape_cast %67 : vector<300xf32> to vector<1x300xf32>
    %cst_28 = arith.constant 8.000000e+00 : f32
    %69 = vector.broadcast %cst_28 : f32 to vector<1x300xf32>
    %70 = arith.divf %68, %69 : vector<1x300xf32>
    %71 = arith.mulf %65, %65 : vector<1x300xf32>
    %72 = arith.subf %70, %71 : vector<1x300xf32>
    %cst_29 = arith.constant 0.000000e+00 : f32
    %73 = vector.broadcast %cst_29 : f32 to vector<1x300xf32>
    %74 = arith.maximumf %72, %73 : vector<1x300xf32>
    %cst_30 = arith.constant 9.99999974E-6 : f32
    %75 = vector.broadcast %cst_30 : f32 to vector<1x300xf32>
    %76 = arith.addf %74, %75 : vector<1x300xf32>
    %77 = math.rsqrt %76 : vector<1x300xf32>
    %78 = arith.mulf %77, %60 : vector<1x300xf32>
    %79 = arith.mulf %65, %78 : vector<1x300xf32>
    %80 = arith.subf %61, %79 : vector<1x300xf32>
    %81 = vector.broadcast %78 : vector<1x300xf32> to vector<8x300xf32>
    %82 = arith.mulf %59, %81 : vector<8x300xf32>
    %83 = vector.broadcast %80 : vector<1x300xf32> to vector<8x300xf32>
    %84 = arith.addf %82, %83 : vector<8x300xf32>
    %c6 = arith.constant 6 : index
    %c0_31 = arith.constant 0 : index
    %85 = vector.load %arg2[%c6, %c0_31] : memref<9x300xf32, #tpu.memory_space<vmem>>, vector<1x300xf32>
    %c7 = arith.constant 7 : index
    %c0_32 = arith.constant 0 : index
    %86 = vector.load %arg2[%c7, %c0_32] : memref<9x300xf32, #tpu.memory_space<vmem>>, vector<1x300xf32>
    %cst_33 = arith.constant dense<0.000000e+00> : vector<8xf32>
    %87 = vector.multi_reduction <add>, %84, %cst_33 [1] : vector<8x300xf32> to vector<8xf32>
    %88 = vector.shape_cast %87 : vector<8xf32> to vector<8x1xf32>
    %cst_34 = arith.constant 3.000000e+02 : f32
    %89 = vector.broadcast %cst_34 : f32 to vector<8x1xf32>
    %90 = arith.divf %88, %89 : vector<8x1xf32>
    %91 = arith.mulf %84, %84 : vector<8x300xf32>
    %cst_35 = arith.constant dense<0.000000e+00> : vector<8xf32>
    %92 = vector.multi_reduction <add>, %91, %cst_35 [1] : vector<8x300xf32> to vector<8xf32>
    %93 = vector.shape_cast %92 : vector<8xf32> to vector<8x1xf32>
    %cst_36 = arith.constant 3.000000e+02 : f32
    %94 = vector.broadcast %cst_36 : f32 to vector<8x1xf32>
    %95 = arith.divf %93, %94 : vector<8x1xf32>
    %96 = arith.mulf %90, %90 : vector<8x1xf32>
    %97 = arith.subf %95, %96 : vector<8x1xf32>
    %cst_37 = arith.constant 0.000000e+00 : f32
    %98 = vector.broadcast %cst_37 : f32 to vector<8x1xf32>
    %99 = arith.maximumf %97, %98 : vector<8x1xf32>
    %100 = vector.broadcast %90 : vector<8x1xf32> to vector<8x300xf32>
    %101 = arith.subf %84, %100 : vector<8x300xf32>
    %cst_38 = arith.constant 9.99999974E-6 : f32
    %102 = vector.broadcast %cst_38 : f32 to vector<8x1xf32>
    %103 = arith.addf %99, %102 : vector<8x1xf32>
    %104 = math.rsqrt %103 : vector<8x1xf32>
    %105 = vector.broadcast %104 : vector<8x1xf32> to vector<8x300xf32>
    %106 = arith.mulf %101, %105 : vector<8x300xf32>
    %107 = vector.broadcast %85 : vector<1x300xf32> to vector<8x300xf32>
    %108 = arith.mulf %106, %107 : vector<8x300xf32>
    %109 = vector.broadcast %86 : vector<1x300xf32> to vector<8x300xf32>
    %110 = arith.addf %108, %109 : vector<8x300xf32>
    %cst_39 = arith.constant 0.000000e+00 : f32
    %111 = vector.broadcast %cst_39 : f32 to vector<8x300xf32>
    %112 = arith.maximumf %110, %111 : vector<8x300xf32>
    %c336 = arith.constant 336 : index
    %c0_40 = arith.constant 0 : index
    %113 = vector.load %arg1[%c336, %c0_40] : memref<352x300xbf16, #tpu.memory_space<vmem>>, vector<8x300xbf16>
    %114 = arith.extf %113 : vector<8x300xbf16> to vector<8x300xf32>
    %c8 = arith.constant 8 : index
    %c0_41 = arith.constant 0 : index
    %115 = vector.load %arg2[%c8, %c0_41] : memref<9x300xf32, #tpu.memory_space<vmem>>, vector<1x8xf32>
    %116 = tpu.transpose %114, [1, 0] : vector<8x300xf32> -> vector<300x8xf32>
    %cst_42 = arith.constant dense<0.000000e+00> : vector<8x8xf32>
    %117 = tpu.matmul %112, %116, %cst_42 {dimension_numbers = #tpu.dot_dimension_numbers<[1], [0], [0], [1], [0, 0, 1, 1], [], []>} : vector<8x300xf32>, vector<300x8xf32>, vector<8x8xf32> -> vector<8x8xf32>
    %118 = vector.broadcast %115 : vector<1x8xf32> to vector<8x8xf32>
    %119 = arith.addf %117, %118 : vector<8x8xf32>
    %cst_43 = arith.constant 0.000000e+00 : f32
    %120 = vector.broadcast %cst_43 : f32 to vector<8x8xf32>
    %121 = arith.maximumf %119, %120 : vector<8x8xf32>
    %c0_44 = arith.constant 0 : index
    %c0_45 = arith.constant 0 : index
    %122 = vector.load %arg3[%c0_44, %c0_45] : memref<8x8xf32, #tpu.memory_space<vmem>>, vector<8x8xf32>
    tpu.vector_store %arg3[%c0_44, %c0_45], %121 {strides = array<i32>} : memref<8x8xf32, #tpu.memory_space<vmem>>, vector<8x8xf32>,
    return
  }
}

</mosaic_0001>

<bundles_post_ra>
// kernel: tpu_custom_call.1
= control target key start
LH: loop header
LB: loop body
LE: loop exit
PB: predicated region body
PF: predicated region fallthrough
CT: control target
= control target key end

     0   :  { %s2057_s0 = inlined_call_operand.vmem [shape: f32[8,32], index: 0, kind: input, shape index: {}]   ;;  %s2058_s1 = inlined_call_operand.vmem [shape: bf16[352,300], index: 1, kind: input, shape index: {}]   ;;  %s2059_s2 = inlined_call_operand.vmem [shape: f32[9,300], index: 2, kind: input, shape index: {}]   ;;  %s2060_s3 = inlined_call_operand.hbm [shape: f32[8,8], index: 3, kind: output, shape index: {}]  }
   0x1   :  { %v1118_v0 = vld [vmem:[%s2058_s1 + $0x18] sm:$0xf]  ;;  %v1375_v1 = vld [vmem:[%s2058_s1 + $0x20] sm:$0xf0]  ;;  %v1374_v2 = vld [vmem:[%s2058_s1 + $0x1c] sm:$0xf] }
   0x2   :  { %v1119_v3 = vor.u32 %v1375_v1, %v1118_v0  ;;  %v1120_v4 = vld [vmem:[%s2058_s1 + $0x24] sm:$0xf0]  ;;  %v1126_v5 = vld [vmem:[%s2058_s1 + $0x20] sm:$0xf]  ;;  %v1376_v6 = vld [vmem:[%s2058_s1 + $0x28] sm:$0xf0] }
   0x3   :  { %v1123_v7 = vor.u32 %v1374_v2, %v1120_v4  ;;  %v1127_v8 = vor.u32 %v1376_v6, %v1126_v5  ;;  %v1106_v9 = vld [vmem:[%s2058_s1] sm:$0xf]  ;;  %v1372_v10 = vld [vmem:[%s2058_s1 + $0x8] sm:$0xf0]  ;;  %v1371_v11 = vld [vmem:[%s2058_s1 + $0x4] sm:$0xf] }
   0x4   :  { %68 = vmatpush.bf16.msra.mxu0 %v1119_v3  ;;  %v1107_v12 = vor.u32 %v1372_v10, %v1106_v9  ;;  %v1108_v13 = vld [vmem:[%s2058_s1 + $0xc] sm:$0xf0]  ;;  %v1114_v14 = vld [vmem:[%s2058_s1 + $0x8] sm:$0xf]  ;;  %v1373_v15 = vld [vmem:[%s2058_s1 + $0x10] sm:$0xf0] }
   0x5   :  { %81 = vmatpush.bf16.msra.mxu1 %v1123_v7  ;;  %94 = vmatpush.bf16.msra.mxu2 %v1127_v8  ;;  %v1111_v16 = vor.u32 %v1371_v11, %v1108_v13  ;;  %v1115_v17 = vor.u32 %v1373_v15, %v1114_v14  ;;  %v16_v18 = vld [vmem:[%s2057_s0] sm:$0xff] }
   0x6   :  { %8 = vsyncpa [#allocation3], 0  ;;  %v17_v19 = vpack.c.bf16 %v16_v18, %v16_v18  ;;  %vm58_vm0 = vcmask 261120   ;;  %v1483_v20 = vmov 8.0   ;;  %vm116_vm1 = vcmask 359424   ;;  %s1485_s8 = smov [#allocation2]  }
   0x7   :  { %1437 = vrcp.f32 %v1483_v20  ;;  %vm219_vm12 = vcmask 1040384   ;;  %vm221_vm13 = vcmask 1041408   ;;  %vm693_vm14 = vcmask 1045504   ;;  %s1093_s9 = sshll.u32 %s1485_s8, 4  ;;  %s1095_s11 = sshll.u32 %s2060_s3, 4  ;;  %s1094_s9 = int_to_ptr.vmem [resolvable:$true] %s1093_s9  ;;  %s1096_s11 = int_to_ptr.hbm [resolvable:$true] %s1095_s11 }
   0x8   :  { %69 = vmatpush.bf16.msra.mxu0 %v1107_v12 }
   0x9   :  { %82 = vmatpush.bf16.msra.mxu1 %v1111_v16  ;;  %95 = vmatpush.bf16.msra.mxu2 %v1115_v17 }
   0xb   :  { %1128 = vmatmul.msk.bf16.vlgmr.msra.gmra.mxu0 %vm58_vm0, %v17_v19 }
   0xc   :  { %1129 = vmatmul.msk.bf16.vlgmr.msra.gmra.mxu1 %vm58_vm0, %v17_v19  ;;  %1130 = vmatmul.msk.bf16.vlgmr.msra.gmra.mxu2 %vm58_vm0, %v17_v19 }
   0xd   :  { %v1438_v21 = vpop.eup %1437 }
   0xe   :  { %v125_v22 = vmul.f32 8.0, %v1438_v21  ;;  %vm129_vm2 = vweird.f32 %v1438_v21 }
  0x10   :  { %v126_v23 = vsub.f32 1.0, %v125_v22 }
  0x12   :  { %v127_v28 = vmul.f32 %v1438_v21, %v126_v23 }
  0x14   :  { %v128_v37 = vadd.f32 %v1438_v21, %v127_v28 }
  0x16   :  { %v1563_v51 = vsel %vm129_vm2, %v1438_v21, %v128_v37 }
  0x88   :  { %v1545_v24 = vpop.f32.mrf.mxu0 }
  0x89   :  { %v104_v25 = vrot.slane %v1545_v24, 4  ;;  %v134_v26 = vmul.f32 %v1545_v24, %v1545_v24  ;;  %v1550_v27 = vpop.f32.mrf.mxu1 }
  0x8a   :  { %v110_v29 = vrot.slane %v1550_v27, 4  ;;  %v135_v30 = vmul.f32 %v1550_v27, %v1550_v27 }
  0x8b   :  { %v105_v31 = vadd.f32 %v104_v25, %v1545_v24  ;;  %v137_v32 = vrot.slane %v134_v26, 4 }
  0x8c   :  { %v111_v33 = vadd.f32 %v110_v29, %v1550_v27  ;;  %v143_v34 = vrot.slane %v135_v30, 4 }
  0x8d   :  { %v106_v35 = vrot.slane %v105_v31, 2  ;;  %v138_v36 = vadd.f32 %v137_v32, %v134_v26 }
  0x8e   :  { %v112_v38 = vrot.slane %v111_v33, 2  ;;  %v144_v39 = vadd.f32 %v143_v34, %v135_v30 }
  0x8f   :  { %v107_v40 = vadd.f32 %v106_v35, %v105_v31  ;;  %v139_v41 = vrot.slane %v138_v36, 2  ;;  %v1557_v42 = vpop.f32.mrf.mxu2 }
  0x90   :  { %v113_v43 = vadd.f32 %v112_v38, %v111_v33  ;;  %v145_v44 = vrot.slane %v144_v39, 2  ;;  %v73_v45 = vpop.f32.mrf.mxu0  ;;  %v117_v48 = vsel %vm116_vm1, %v1557_v42, 0.0  ;;  %v136_v49 = vmul.f32 %v1557_v42, %v1557_v42  ;;  %v101_v38 = vld [vmem:[%s2059_s2] ss:$8 sm:$0x7] }
  0x91   :  { %v108_v46 = vrot.slane %v107_v40, 1  ;;  %v140_v47 = vadd.f32 %v139_v41, %v138_v36  ;;  %v86_v50 = vpop.f32.mrf.mxu1  ;;  %v118_v54 = vrot.slane %v117_v48, 4 }
  0x92   :  { %v114_v52 = vrot.slane %v113_v43, 1  ;;  %v146_v53 = vadd.f32 %v145_v44, %v144_v39  ;;  %v149_v57 = vsel %vm116_vm1, %v136_v49, 0.0  ;;  %v203_v44 = vperm.slane %v101_v38, 1 }
  0x93   :  { %v109_v55 = vadd.f32 %v108_v46, %v107_v40  ;;  %v141_v56 = vrot.slane %v140_v47, 1  ;;  %v119_v60 = vadd.f32 %v118_v54, %v117_v48  ;;  %v150_v61 = vrot.slane %v149_v57, 4 }
  0x94   :  { %v115_v58 = vadd.f32 %v114_v52, %v113_v43  ;;  %v147_v59 = vrot.slane %v146_v53, 1  ;;  %v202_v52 = vperm.slane %v101_v38, 0 }
  0x95   :  { %v1567_v62 = vmul.f32 %v1563_v51, %v109_v55  ;;  %v142_v63 = vadd.f32 %v141_v56, %v140_v47  ;;  %v120_v2 = vrot.slane %v119_v60, 2  ;;  %v151_v3 = vadd.f32 %v150_v61, %v149_v57 }
  0x96   :  { %v132_v0 = vmul.f32 %v1563_v51, %v115_v58  ;;  %v148_v1 = vadd.f32 %v147_v59, %v146_v53  ;;  %v204_v55 = vperm.slane %v101_v38, 2  ;;  %v1417_v38 = vld [vmem:[%s2058_s1 + $0x170] sm:$0xf0] }
  0x97   :  { %v156_v4 = vmul.f32 %v142_v63, %v1563_v51  ;;  %v159_v5 = vmul.f32 %v1567_v62, %v1567_v62  ;;  %v99_v6 = vpop.f32.mrf.mxu2  ;;  %v121_v9 = vadd.f32 %v120_v2, %v119_v60  ;;  %v152_v10 = vrot.slane %v151_v3, 2 }
  0x98   :  { %v157_v7 = vmul.f32 %v148_v1, %v1563_v51  ;;  %v160_v8 = vmul.f32 %v132_v0, %v132_v0 }
  0x99   :  { %v162_v11 = vsub.f32 %v156_v4, %v159_v5  ;;  %v122_v13 = vrot.slane %v121_v9, 1  ;;  %v153_v14 = vadd.f32 %v152_v10, %v151_v3  ;;  %v1131_v5 = vld [vmem:[%s2059_s2 + $0x1] ss:$8 sm:$0x7] }
  0x9a   :  { %v163_v12 = vsub.f32 %v157_v7, %v160_v8 }
  0x9b   :  { %v165_v15 = vmax.f32 %v162_v11, 0.0  ;;  %v123_v17 = vadd.f32 %v122_v13, %v121_v9  ;;  %v154_v18 = vrot.slane %v153_v14, 1 }
  0x9c   :  { %v166_v16 = vmax.f32 %v163_v12, 0.0 }
  0x9d   :  { %v168_v19 = vadd.f32 1e-05, %v165_v15  ;;  %v133_v21 = vmul.f32 %v1563_v51, %v123_v17  ;;  %v155_v22 = vadd.f32 %v154_v18, %v153_v14 }
  0x9e   :  { %v169_v20 = vadd.f32 1e-05, %v166_v16 }
  0x9f   :  { %1439 = vrsqrt.f32 %v168_v19  ;;  %v158_v23 = vmul.f32 %v155_v22, %v1563_v51  ;;  %v161_v25 = vmul.f32 %v133_v21, %v133_v21  ;;  %vm177_vm7 = vweird.f32 %v168_v19 }
  0xa0   :  { %1441 = vrsqrt.f32 %v169_v20  ;;  %vm187_vm4 = vweird.f32 %v169_v20 }
  0xa1   :  { %v164_v26 = vsub.f32 %v158_v23, %v161_v25  ;;  %v1316_v23 = vld [vmem:[%s2058_s1 + $0x198] sm:$0xf]  ;;  %v1423_v25 = vld [vmem:[%s2058_s1 + $0x1a0] sm:$0xf0] }
  0xa3   :  { %v167_v28 = vmax.f32 %v164_v26, 0.0  ;;  %v1398_v26 = vld [vmem:[%s2058_s1 + $0xdc] sm:$0xf] }
  0xa5   :  { %v1440_v29 = vpop.eup %1439  ;;  %v170_v32 = vadd.f32 1e-05, %v167_v28  ;;  %v1317_v28 = vor.u32 %v1423_v25, %v1316_v23 }
  0xa6   :  { %v1442_v30 = vpop.eup %1441  ;;  %v172_v31 = vmul.f32 %v1440_v29, %v168_v19  ;;  %vm178_vm6 = vweird.f32 %v1440_v29 }
  0xa7   :  { %v182_v33 = vmul.f32 %v1442_v30, %v169_v20  ;;  %1443 = vrsqrt.f32 %v170_v32  ;;  %vm188_vm3 = vweird.f32 %v1442_v30  ;;  %vm179_vm8 = vmor %vm177_vm7, %vm178_vm6  ;;  %vm197_vm10 = vweird.f32 %v170_v32  ;;  %716 = vmatpush.bf16.msrb.mxu0 %v1317_v28  ;;  %v1184_v28 = vld [vmem:[%s2058_s1 + $0x90] sm:$0xf] }
  0xa8   :  { %v173_v34 = vmul.f32 %v1440_v29, %v172_v31  ;;  %vm189_vm5 = vmor %vm187_vm4, %vm188_vm3  ;;  %v1304_v31 = vld [vmem:[%s2058_s1 + $0x180] sm:$0xf] }
  0xa9   :  { %v183_v35 = vmul.f32 %v1442_v30, %v182_v33  ;;  %v1395_v33 = vld [vmem:[%s2058_s1 + $0xc4] sm:$0xf] }
  0xaa   :  { %v174_v36 = vmul.f32 0.5, %v173_v34 }
  0xab   :  { %v184_v37 = vmul.f32 0.5, %v183_v35  ;;  %v1210_v35 = vld [vmem:[%s2058_s1 + $0xcc] sm:$0xf0] }
  0xac   :  { %v175_v41 = vsub.f32 1.5, %v174_v36  ;;  %v1213_v36 = vor.u32 %v1395_v33, %v1210_v35  ;;  %v1328_v33 = vld [vmem:[%s2058_s1 + $0x1b0] sm:$0xf]  ;;  %v1426_v35 = vld [vmem:[%s2058_s1 + $0x1b8] sm:$0xf0] }
  0xad   :  { %v185_v39 = vsub.f32 1.5, %v184_v37  ;;  %v1444_v40 = vpop.eup %1443  ;;  %v1292_v37 = vld [vmem:[%s2058_s1 + $0x168] sm:$0xf] }
  0xae   :  { %v192_v45 = vmul.f32 %v1444_v40, %v170_v32  ;;  %v176_v48 = vmul.f32 %v1440_v29, %v175_v41  ;;  %vm198_vm9 = vweird.f32 %v1444_v40  ;;  %v1420_v32 = vld [vmem:[%s2058_s1 + $0x188] sm:$0xf0]  ;;  %v1293_v41 = vor.u32 %v1417_v38, %v1292_v37  ;;  %v1138_v37 = vld [vmem:[%s2058_s1 + $0x3c] sm:$0xf0] }
  0xaf   :  { %v186_v43 = vmul.f32 %v1442_v30, %v185_v39  ;;  %vm199_vm11 = vmor %vm197_vm10, %vm198_vm9  ;;  %v1305_v34 = vor.u32 %v1420_v32, %v1304_v31  ;;  %v1392_v39 = vld [vmem:[%s2058_s1 + $0xac] sm:$0xf]  ;;  %v1232_v31 = vld [vmem:[%s2058_s1 + $0xf0] sm:$0xf] }
  0xb0   :  { %v193_v47 = vmul.f32 %v1444_v40, %v192_v45  ;;  %v180_v54 = vsel %vm179_vm8, %v1440_v29, %v176_v48  ;;  %v1222_v29 = vld [vmem:[%s2058_s1 + $0xe4] sm:$0xf0]  ;;  %v1280_v45 = vld [vmem:[%s2058_s1 + $0x150] sm:$0xf]  ;;  %v1402_v32 = vld [vmem:[%s2058_s1 + $0xf8] sm:$0xf0] }
  0xb1   :  { %v190_v46 = vsel %vm189_vm5, %v1442_v30, %v186_v43  ;;  %v208_v58 = vmul.f32 %v202_v52, %v180_v54  ;;  %v1225_v30 = vor.u32 %v1398_v26, %v1222_v29  ;;  %717 = vmatpush.bf16.msrb.mxu0 %v1305_v34  ;;  %v1198_v43 = vld [vmem:[%s2058_s1 + $0xb4] sm:$0xf0]  ;;  %v1399_v52 = vld [vmem:[%s2058_s1 + $0xe0] sm:$0xf0]  ;;  %v1390_v29 = vld [vmem:[%s2058_s1 + $0x98] sm:$0xf0]  ;;  %v1233_v34 = vor.u32 %v1402_v32, %v1232_v31 }
  0xb2   :  { %v209_v49 = vmul.f32 %v203_v44, %v190_v46  ;;  %v194_v50 = vmul.f32 0.5, %v193_v47  ;;  %v1201_v44 = vor.u32 %v1392_v39, %v1198_v43  ;;  %v1414_v46 = vld [vmem:[%s2058_s1 + $0x158] sm:$0xf0]  ;;  %v1389_v47 = vld [vmem:[%s2058_s1 + $0x94] sm:$0xf]  ;;  %v1329_v39 = vor.u32 %v1426_v35, %v1328_v33 }
  0xb3   :  { %v211_v1 = vmul.f32 %v208_v58, %v1567_v62  ;;  %v225_v2 = vperm.slane %v208_v58, 0  ;;  %742 = vmatpush.bf16.msrb.mxu2 %v1225_v30  ;;  %v1281_v48 = vor.u32 %v1414_v46, %v1280_v45  ;;  %v1386_v58 = vld [vmem:[%s2058_s1 + $0x7c] sm:$0xf]  ;;  %v1185_v30 = vor.u32 %v1390_v29, %v1184_v28  ;;  %v1387_v43 = vld [vmem:[%s2058_s1 + $0x80] sm:$0xf0] }
  0xb4   :  { %v195_v53 = vsub.f32 1.5, %v194_v50  ;;  %v212_v56 = vmul.f32 %v209_v49, %v132_v0  ;;  %v226_v3 = vperm.slane %v209_v49, 0  ;;  %v1186_v49 = vld [vmem:[%s2058_s1 + $0x9c] sm:$0xf0]  ;;  %v1220_v50 = vld [vmem:[%s2058_s1 + $0xd8] sm:$0xf] }
  0xb5   :  { %v228_v9 = vmul.f32 %v225_v2, %v1545_v24  ;;  %718 = vmatpush.bf16.msrb.mxu0 %v1293_v41  ;;  %v1221_v54 = vor.u32 %v1399_v52, %v1220_v50  ;;  %v1172_v41 = vld [vmem:[%s2058_s1 + $0x78] sm:$0xf]  ;;  %v1318_v46 = vld [vmem:[%s2058_s1 + $0x1a4] sm:$0xf0]  ;;  %v1324_v52 = vld [vmem:[%s2058_s1 + $0x1a0] sm:$0xf] }
  0xb6   :  { %v196_v57 = vmul.f32 %v1444_v40, %v195_v53  ;;  %v217_v61 = vrot.slane %v212_v56, 7  ;;  %v229_v10 = vmul.f32 %v226_v3, %v1550_v27  ;;  %v1189_v53 = vor.u32 %v1389_v47, %v1186_v49  ;;  %v1268_v56 = vld [vmem:[%s2058_s1 + $0x138] sm:$0xf]  ;;  %v1228_v47 = vld [vmem:[%s2058_s1 + $0xe0] sm:$0xf] }
  0xb7   :  { %743 = vmatpush.bf16.msrb.mxu2 %v1213_v36  ;;  %703 = vmatpush.bf16.msra.mxu3 %v1221_v54  ;;  %v1377_v36 = vld [vmem:[%s2058_s1 + $0x34] sm:$0xf]  ;;  %v1173_v45 = vor.u32 %v1387_v43, %v1172_v41  ;;  %v1388_v41 = vld [vmem:[%s2058_s1 + $0x88] sm:$0xf0]  ;;  %v1276_v43 = vld [vmem:[%s2058_s1 + $0x140] sm:$0xf] }
  0xb8   :  { %v200_v59 = vsel %vm199_vm11, %v1444_v40, %v196_v57  ;;  %v220_v6 = vsel %vm219_vm12, %v211_v1, %v217_v61  ;;  %v1484_v40 = vmov 300.0   ;;  %v1411_v57 = vld [vmem:[%s2058_s1 + $0x140] sm:$0xf0]  ;;  %v1208_v61 = vld [vmem:[%s2058_s1 + $0xc0] sm:$0xf] }
  0xb9   :  { %v210_v60 = vmul.f32 %v204_v55, %v200_v59  ;;  %1445 = vrcp.f32 %v1484_v40  ;;  %719 = vmatpush.bf16.msrb.mxu0 %v1281_v48  ;;  %v1269_v59 = vor.u32 %v1411_v57, %v1268_v56  ;;  %v1141_v40 = vor.u32 %v1377_v36, %v1138_v37  ;;  %v1400_v48 = vld [vmem:[%s2058_s1 + $0xe8] sm:$0xf0]  ;;  %v1160_v57 = vld [vmem:[%s2058_s1 + $0x60] sm:$0xf]  ;;  %v1410_v36 = vld [vmem:[%s2058_s1 + $0x13c] sm:$0xf] }
  0xba   :  { %v1229_v50 = vor.u32 %v1400_v48, %v1228_v47  ;;  %v1270_v37 = vld [vmem:[%s2058_s1 + $0x144] sm:$0xf0]  ;;  %v1412_v47 = vld [vmem:[%s2058_s1 + $0x148] sm:$0xf0] }
  0xbb   :  { %v213_v63 = vmul.f32 %v210_v60, %v133_v21  ;;  %v227_v0 = vperm.slane %v210_v60, 0  ;;  %744 = vmatpush.bf16.msrb.mxu2 %v1201_v44  ;;  %v1174_v60 = vld [vmem:[%s2058_s1 + $0x84] sm:$0xf0]  ;;  %v1422_v44 = vld [vmem:[%s2058_s1 + $0x19c] sm:$0xf] }
  0xbc   :  { %v1177_v2 = vor.u32 %v1386_v58, %v1174_v60  ;;  %v1321_v49 = vor.u32 %v1422_v44, %v1318_v46  ;;  %v1384_v58 = vld [vmem:[%s2058_s1 + $0x68] sm:$0xf0]  ;;  %v1431_v44 = vld [vmem:[%s2058_s1 + $0x1e4] sm:$0xf] }
  0xbd   :  { %v218_v4 = vrot.slane %v213_v63, 6  ;;  %v230_v62 = vmul.f32 %v227_v0, %v1557_v42  ;;  %v1396_v63 = vld [vmem:[%s2058_s1 + $0xc8] sm:$0xf0]  ;;  %720 = vmatpush.bf16.msrb.mxu0 %v1269_v59  ;;  %v1256_v0 = vld [vmem:[%s2058_s1 + $0x120] sm:$0xf] }
  0xbe   :  { %v1209_v3 = vor.u32 %v1396_v63, %v1208_v61  ;;  %v1419_v59 = vld [vmem:[%s2058_s1 + $0x184] sm:$0xf]  ;;  %v1161_v61 = vor.u32 %v1384_v58, %v1160_v57  ;;  %v1306_v63 = vld [vmem:[%s2058_s1 + $0x18c] sm:$0xf0]  ;;  %v1264_v57 = vld [vmem:[%s2058_s1 + $0x128] sm:$0xf] }
  0xbf   :  { %v222_v7 = vsel %vm221_vm13, %v220_v6, %v218_v4  ;;  %v1659_v55 = vpop.eup %1445  ;;  %745 = vmatpush.bf16.msrb.mxu2 %v1189_v53  ;;  %v1352_v4 = vld [vmem:[%s2058_s1 + $0x1e0] sm:$0xf]  ;;  %v1408_v6 = vld [vmem:[%s2058_s1 + $0x128] sm:$0xf0] }
  0xc0   :  { %v224_v8 = vsub.f32 %v1131_v5, %v222_v7  ;;  %v251_v1 = vmul.f32 300.0, %v1659_v55  ;;  %v1432_v5 = vld [vmem:[%s2058_s1 + $0x1e8] sm:$0x30]  ;;  %704 = vmatpush.bf16.msra.mxu3 %v1209_v3  ;;  %vm255_vm15 = vweird.f32 %v1659_v55  ;;  %v1309_v3 = vor.u32 %v1419_v59, %v1306_v63  ;;  %v1409_v63 = vld [vmem:[%s2058_s1 + $0x130] sm:$0xf0] }
  0xc1   :  { %v1353_v7 = vor.u32 %v1432_v5, %v1352_v4  ;;  %v1424_v53 = vld [vmem:[%s2058_s1 + $0x1a8] sm:$0xf0]  ;;  %v1421_v5 = vld [vmem:[%s2058_s1 + $0x190] sm:$0xf0] }
  0xc2   :  { %v232_v11 = vperm.slane %v224_v8, 0  ;;  %v233_v12 = vperm.slane %v224_v8, 1  ;;  %v234_v13 = vperm.slane %v224_v8, 2  ;;  %v1383_v8 = vld [vmem:[%s2058_s1 + $0x64] sm:$0xf]  ;;  %v1325_v56 = vor.u32 %v1424_v53, %v1324_v52 }
  0xc3   :  { %746 = vmatpush.bf16.msrb.mxu2 %v1177_v2  ;;  %v1397_v2 = vld [vmem:[%s2058_s1 + $0xd0] sm:$0xf0]  ;;  %v1407_v52 = vld [vmem:[%s2058_s1 + $0x124] sm:$0xf]  ;;  %v1258_v53 = vld [vmem:[%s2058_s1 + $0x12c] sm:$0xf0] }
  0xc4   :  { %v1588_v14 = vadd.f32 %v232_v11, %v228_v9  ;;  %v1590_v15 = vadd.f32 %v233_v12, %v229_v10  ;;  %v1592_v16 = vadd.f32 %v234_v13, %v230_v62  ;;  %v1257_v9 = vor.u32 %v1408_v6, %v1256_v0  ;;  %v1162_v10 = vld [vmem:[%s2058_s1 + $0x6c] sm:$0xf0]  ;;  %v1196_v62 = vld [vmem:[%s2058_s1 + $0xa8] sm:$0xf]  ;;  %v1381_v6 = vld [vmem:[%s2058_s1 + $0x50] sm:$0xf0] }
  0xc5   :  { %v252_v11 = vsub.f32 1.0, %v251_v1  ;;  %v695_v12 = vsel %vm693_vm14, %v1353_v7, 0  ;;  %v1165_v13 = vor.u32 %v1383_v8, %v1162_v10  ;;  %v1216_v1 = vld [vmem:[%s2058_s1 + $0xc8] sm:$0xf]  ;;  %v1416_v7 = vld [vmem:[%s2058_s1 + $0x16c] sm:$0xf]  ;;  %v1261_v59 = vor.u32 %v1407_v52, %v1258_v53 }
  0xc6   :  { %v245_v17 = vadd.f32 %v1590_v15, %v1588_v14  ;;  %v246_v18 = vsel %vm116_vm1, %v1592_v16, 0.0  ;;  %v258_v27 = vmul.f32 %v1588_v14, %v1588_v14  ;;  %v259_v42 = vmul.f32 %v1590_v15, %v1590_v15  ;;  %721 = vmatpush.bf16.msrb.mxu0 %v1257_v9  ;;  %734 = vmatpush.bf16.msrb.mxu1 %v695_v12  ;;  %v1148_v0 = vld [vmem:[%s2058_s1 + $0x48] sm:$0xf]  ;;  %v1294_v8 = vld [vmem:[%s2058_s1 + $0x174] sm:$0xf0] }
  0xc7   :  { %v260_v19 = vmul.f32 %v1592_v16, %v1592_v16  ;;  %747 = vmatpush.bf16.msrb.mxu2 %v1165_v13  ;;  %v253_v23 = vmul.f32 %v1659_v55, %v252_v11  ;;  %v1217_v4 = vor.u32 %v1397_v2, %v1216_v1  ;;  %v1204_v11 = vld [vmem:[%s2058_s1 + $0xb0] sm:$0xf]  ;;  %v1394_v12 = vld [vmem:[%s2058_s1 + $0xb8] sm:$0xf0]  ;;  %v1428_v1 = vld [vmem:[%s2058_s1 + $0x1cc] sm:$0xf]  ;;  %v1265_v2 = vor.u32 %v1409_v63, %v1264_v57 }
  0xc8   :  { %v247_v24 = vadd.f32 %v246_v18, %v245_v17  ;;  %v261_v20 = vadd.f32 %v259_v42, %v258_v27  ;;  %v1393_v17 = vld [vmem:[%s2058_s1 + $0xb0] sm:$0xf0]  ;;  %v1340_v42 = vld [vmem:[%s2058_s1 + $0x1c8] sm:$0xf]  ;;  %v1300_v13 = vld [vmem:[%s2058_s1 + $0x170] sm:$0xf] }
  0xc9   :  { %v262_v21 = vsel %vm116_vm1, %v260_v19, 0.0  ;;  %v1197_v18 = vor.u32 %v1393_v17, %v1196_v62  ;;  %v1405_v27 = vld [vmem:[%s2058_s1 + $0x110] sm:$0xf0]  ;;  %v254_v38 = vadd.f32 %v1659_v55, %v253_v23  ;;  %v1149_v62 = vor.u32 %v1381_v6, %v1148_v0  ;;  %v1391_v23 = vld [vmem:[%s2058_s1 + $0xa0] sm:$0xf0] }
  0xca   :  { %248 = vadd.xlane.f32.xlu0 %v247_v24  ;;  %v263_v22 = vadd.f32 %v262_v21, %v261_v20  ;;  %v1244_v24 = vld [vmem:[%s2058_s1 + $0x108] sm:$0xf]  ;;  %v1429_v20 = vld [vmem:[%s2058_s1 + $0x1d0] sm:$0xf0]  ;;  %v1380_v21 = vld [vmem:[%s2058_s1 + $0x4c] sm:$0xf]  ;;  %v1297_v17 = vor.u32 %v1416_v7, %v1294_v8 }
  0xcb   :  { %705 = vmatpush.bf16.msra.mxu3 %v1197_v18  ;;  %v1245_v19 = vor.u32 %v1405_v27, %v1244_v24  ;;  %v1341_v25 = vor.u32 %v1429_v20, %v1340_v42  ;;  %v1786_v60 = vsel %vm255_vm15, %v1659_v55, %v254_v38  ;;  %v1312_v55 = vld [vmem:[%s2058_s1 + $0x188] sm:$0xf]  ;;  %v1205_v18 = vor.u32 %v1394_v12, %v1204_v11  ;;  %v1418_v24 = vld [vmem:[%s2058_s1 + $0x178] sm:$0xf0]  ;;  %v1136_v27 = vld [vmem:[%s2058_s1 + $0x30] sm:$0xf] }
  0xcc   :  { %v1313_v10 = vor.u32 %v1421_v5, %v1312_v55  ;;  %v1378_v42 = vld [vmem:[%s2058_s1 + $0x38] sm:$0xf0]  ;;  %v1413_v20 = vld [vmem:[%s2058_s1 + $0x154] sm:$0xf]  ;;  %v1180_v38 = vld [vmem:[%s2058_s1 + $0x80] sm:$0xf] }
  0xcd   :  { %722 = vmatpush.bf16.msrb.mxu0 %v1245_v19  ;;  %735 = vmatpush.bf16.msrb.mxu1 %v1341_v25  ;;  %v1301_v19 = vor.u32 %v1418_v24, %v1300_v13  ;;  %v1288_v25 = vld [vmem:[%s2058_s1 + $0x158] sm:$0xf]  ;;  %v1181_v46 = vor.u32 %v1388_v41, %v1180_v38  ;;  %v1156_v0 = vld [vmem:[%s2058_s1 + $0x50] sm:$0xf]  ;;  %v1382_v6 = vld [vmem:[%s2058_s1 + $0x58] sm:$0xf0] }
  0xce   :  { %v1246_v55 = vld [vmem:[%s2058_s1 + $0x114] sm:$0xf0]  ;;  %v1252_v7 = vld [vmem:[%s2058_s1 + $0x110] sm:$0xf]  ;;  %v1406_v8 = vld [vmem:[%s2058_s1 + $0x118] sm:$0xf0]  ;;  %v1157_v12 = vor.u32 %v1382_v6, %v1156_v0 }
  0xcf   :  { %706 = vmatpush.bf16.msra.mxu3 %v1185_v30  ;;  %v1137_v30 = vor.u32 %v1378_v42, %v1136_v27  ;;  %v1401_v13 = vld [vmem:[%s2058_s1 + $0xf4] sm:$0xf]  ;;  %v1234_v24 = vld [vmem:[%s2058_s1 + $0xfc] sm:$0xf0]  ;;  %v1144_v27 = vld [vmem:[%s2058_s1 + $0x38] sm:$0xf] }
  0xd0   :  { %v1379_v42 = vld [vmem:[%s2058_s1 + $0x40] sm:$0xf0] }
  0xd1   :  { %723 = vmatpush.bf16.msrb.mxu0 %v1233_v34  ;;  %736 = vmatpush.bf16.msrb.mxu1 %v1329_v39 }
  0xd2   :  { %264 = vadd.xlane.f32.xlu0 %v263_v22  ;;  %v1150_v22 = vld [vmem:[%s2058_s1 + $0x54] sm:$0xf0] }
  0xd3   :  { %v1153_v26 = vor.u32 %v1380_v21, %v1150_v22  ;;  %707 = vmatpush.bf16.msra.mxu3 %v1173_v45  ;;  %v1282_v21 = vld [vmem:[%s2058_s1 + $0x15c] sm:$0xf0]  ;;  %v1192_v22 = vld [vmem:[%s2058_s1 + $0x98] sm:$0xf]  ;;  %v1354_v45 = vld [vmem:[%s2058_s1 + $0x1ec] sm:$0x30] }
  0xd4   :  { %v1285_v32 = vor.u32 %v1413_v20, %v1282_v21  ;;  %v1193_v33 = vor.u32 %v1391_v23, %v1192_v22  ;;  %v1240_v20 = vld [vmem:[%s2058_s1 + $0xf8] sm:$0xf]  ;;  %v1403_v21 = vld [vmem:[%s2058_s1 + $0x100] sm:$0xf0]  ;;  %v1237_v23 = vor.u32 %v1401_v13, %v1234_v24 }
  0xd5   :  { %748 = vmatpush.bf16.msrb.mxu2 %v1153_v26  ;;  %755 = vmatpush.bf16.msra.mxu1 %v1321_v49  ;;  %v1415_v26 = vld [vmem:[%s2058_s1 + $0x160] sm:$0xf0]  ;;  %v1357_v49 = vor.u32 %v1431_v44, %v1354_v45 }
  0xd6   :  { %781 = vmatpush.bf16.msra.mxu0 %v1229_v50  ;;  %v1289_v34 = vor.u32 %v1415_v26, %v1288_v25  ;;  %v1277_v50 = vor.u32 %v1412_v47, %v1276_v43  ;;  %v1145_v25 = vor.u32 %v1379_v42, %v1144_v27 }
  0xd7   :  { %708 = vmatpush.bf16.msra.mxu3 %v1161_v61  ;;  %v698_v58 = vsel %vm693_vm14, %v1357_v49, 0 }
  0xd9   :  { %749 = vmatpush.bf16.msrb.mxu2 %v1141_v40  ;;  %756 = vmatpush.bf16.msra.mxu1 %v1309_v3  ;;  %v1273_v40 = vor.u32 %v1410_v36, %v1270_v37  ;;  %v1342_v3 = vld [vmem:[%s2058_s1 + $0x1d4] sm:$0xf0] }
  0xda   :  { %782 = vmatpush.bf16.msra.mxu0 %v1217_v4  ;;  %v1404_v4 = vld [vmem:[%s2058_s1 + $0x10c] sm:$0xf]  ;;  %v1345_v5 = vor.u32 %v1428_v1, %v1342_v3  ;;  %v1348_v1 = vld [vmem:[%s2058_s1 + $0x1d0] sm:$0xf] }
  0xdb   :  { %709 = vmatpush.bf16.msra.mxu3 %v1149_v62  ;;  %v1330_v62 = vld [vmem:[%s2058_s1 + $0x1bc] sm:$0xf0]  ;;  %v1249_v11 = vor.u32 %v1404_v4, %v1246_v55  ;;  %v1336_v4 = vld [vmem:[%s2058_s1 + $0x1b8] sm:$0xf]  ;;  %v1427_v55 = vld [vmem:[%s2058_s1 + $0x1c0] sm:$0xf0] }
  0xdd   :  { %794 = vmatpush.bf16.msra.mxu2 %v1325_v56  ;;  %757 = vmatpush.bf16.msra.mxu1 %v1297_v17  ;;  %v1385_v56 = vld [vmem:[%s2058_s1 + $0x70] sm:$0xf0]  ;;  %v1253_v17 = vor.u32 %v1406_v8, %v1252_v7 }
  0xde   :  { %783 = vmatpush.bf16.msra.mxu0 %v1205_v18 }
  0xdf   :  { %710 = vmatpush.bf16.msra.mxu3 %v1137_v30 }
  0xe1   :  { %795 = vmatpush.bf16.msra.mxu2 %v1313_v10  ;;  %758 = vmatpush.bf16.msra.mxu1 %v1285_v32  ;;  %v1425_v10 = vld [vmem:[%s2058_s1 + $0x1b4] sm:$0xf]  ;;  %v1133_v32 = vld [vmem:[%s2059_s2 + $0x3] ss:$8 sm:$0x7] }
  0xe2   :  { %784 = vmatpush.bf16.msra.mxu0 %v1193_v33  ;;  %v1333_v18 = vor.u32 %v1425_v10, %v1330_v62  ;;  %v298_v41 = vperm.slane %v1133_v32, 0  ;;  %v299_v43 = vperm.slane %v1133_v32, 1 }
  0xe3   :  { %773 = vmatpush.bf16.msrb.mxu3 %v698_v58 }
  0xe5   :  { %796 = vmatpush.bf16.msra.mxu2 %v1301_v19  ;;  %759 = vmatpush.bf16.msra.mxu1 %v1273_v40 }
  0xe6   :  { %785 = vmatpush.bf16.msra.mxu0 %v1181_v46 }
  0xe7   :  { %774 = vmatpush.bf16.msrb.mxu3 %v1345_v5  ;;  %v1337_v5 = vor.u32 %v1427_v55, %v1336_v4 }
  0xe9   :  { %797 = vmatpush.bf16.msra.mxu2 %v1289_v34  ;;  %760 = vmatpush.bf16.msra.mxu1 %v1261_v59 }
  0xeb   :  { %775 = vmatpush.bf16.msrb.mxu3 %v1333_v18 }
  0xed   :  { %798 = vmatpush.bf16.msra.mxu2 %v1277_v50  ;;  %761 = vmatpush.bf16.msra.mxu1 %v1249_v11 }
  0xf1   :  { %799 = vmatpush.bf16.msra.mxu2 %v1265_v2  ;;  %762 = vmatpush.bf16.msra.mxu1 %v1237_v23  ;;  %v1430_v2 = vld [vmem:[%s2058_s1 + $0x1d8] sm:$0xf0] }
  0xf2   :  { %v1349_v3 = vor.u32 %v1430_v2, %v1348_v1 }
  0xf5   :  { %800 = vmatpush.bf16.msra.mxu2 %v1253_v17 }
 0x13d   :  { %v249_v54 = vpop.xlane.xlu0 %248 }
 0x13e   :  { %v1816_v9 = vmul.f32 %v1786_v60, %v249_v54  ;;  %v1168_v54 = vld [vmem:[%s2058_s1 + $0x68] sm:$0xf] }
 0x13f   :  { %v1169_v61 = vor.u32 %v1385_v56, %v1168_v54 }
 0x140   :  { %v267_v28 = vmul.f32 %v1816_v9, %v1816_v9  ;;  %v270_v33 = vsub.f32 %v1588_v14, %v1816_v9  ;;  %v271_v34 = vsub.f32 %v1590_v15, %v1816_v9  ;;  %v272_v36 = vsub.f32 %v1592_v16, %v1816_v9  ;;  %v1433_v16 = vld [vmem:[%s2058_s1 + $0x1f0] sm:$0x30] }
 0x141   :  { %786 = vmatpush.bf16.msra.mxu0 %v1169_v61  ;;  %v300_v14 = vperm.slane %v1133_v32, 2 }
 0x145   :  { %v265_v29 = vpop.xlane.xlu0 %264  ;;  %787 = vmatpush.bf16.msra.mxu0 %v1157_v12 }
 0x146   :  { %v266_v31 = vmul.f32 %v265_v29, %v1786_v60 }
 0x148   :  { %v268_v35 = vsub.f32 %v266_v31, %v267_v28  ;;  %v1241_v28 = vor.u32 %v1403_v21, %v1240_v20  ;;  %v1132_v31 = vld [vmem:[%s2059_s2 + $0x2] ss:$8 sm:$0x7] }
 0x149   :  { %788 = vmatpush.bf16.msra.mxu0 %v1145_v25  ;;  %v288_v37 = vperm.slane %v1132_v31, 0  ;;  %v289_v38 = vperm.slane %v1132_v31, 1 }
 0x14a   :  { %v269_v39 = vmax.f32 %v268_v35, 0.0  ;;  %801 = vmatpush.bf16.msra.mxu2 %v1241_v28 }
 0x14c   :  { %v1881_v48 = vadd.f32 1e-05, %v269_v39  ;;  %v290_v39 = vperm.slane %v1132_v31, 2 }
 0x14e   :  { %1447 = vrsqrt.f32 %v1881_v48  ;;  %vm280_vm2 = vweird.f32 %v1881_v48 }
 0x154   :  { %v1448_v19 = vpop.eup %1447 }
 0x155   :  { %v275_v22 = vmul.f32 %v1448_v19, %v1881_v48  ;;  %vm281_vm0 = vweird.f32 %v1448_v19  ;;  %v1360_v48 = vld [vmem:[%s2058_s1 + $0x1e8] sm:$0xf] }
 0x156   :  { %vm282_vm3 = vmor %vm280_vm2, %vm281_vm0  ;;  %v1361_v53 = vor.u32 %v1433_v16, %v1360_v48 }
 0x157   :  { %v276_v26 = vmul.f32 %v1448_v19, %v275_v22 }
 0x158   :  { %v701_v63 = vsel %vm693_vm14, %v1361_v53, 0 }
 0x159   :  { %v277_v29 = vmul.f32 0.5, %v276_v26 }
 0x15b   :  { %v278_v30 = vsub.f32 1.5, %v277_v29 }
 0x15d   :  { %v279_v35 = vmul.f32 %v1448_v19, %v278_v30 }
 0x15f   :  { %v283_v40 = vsel %vm282_vm3, %v1448_v19, %v279_v35 }
 0x160   :  { %v284_v44 = vmul.f32 %v283_v40, %v270_v33  ;;  %v285_v45 = vmul.f32 %v283_v40, %v271_v34  ;;  %v286_v46 = vmul.f32 %v283_v40, %v272_v36 }
 0x162   :  { %v294_v47 = vmul.f32 %v288_v37, %v284_v44  ;;  %v295_v49 = vmul.f32 %v289_v38, %v285_v45  ;;  %v296_v15 = vmul.f32 %v290_v39, %v286_v46 }
 0x164   :  { %v304_v9 = vadd.f32 %v298_v41, %v294_v47  ;;  %v305_v50 = vadd.f32 %v299_v43, %v295_v49  ;;  %v306_v52 = vadd.f32 %v300_v14, %v296_v15 }
 0x166   :  { %v307_v54 = vmax.f32 %v304_v9, 0.0  ;;  %v308_v56 = vmax.f32 %v305_v50, 0.0  ;;  %v309_v57 = vmax.f32 %v306_v52, 0.0 }
 0x168   :  { %v386_v58 = vpack.c.bf16 %v307_v54, %v307_v54  ;;  %v387_v59 = vpack.c.bf16 %v308_v56, %v308_v56  ;;  %v388_v61 = vpack.c.bf16 %v309_v57, %v309_v57 }
 0x16a   :  { %711 = vmatmul.bf16.vlgmr.msra.gmra.mxu3 %v386_v58  ;;  %724 = vmatmul.bf16.vlgmr.msrb.gmra.mxu0 %v387_v59 }
 0x16b   :  { %1362 = vmatmul.msk.bf16.vlgmr.msrb.gmra.mxu1 %vm116_vm1, %v388_v61  ;;  %750 = vmatmul.bf16.vlgmr.msrb.gmra.mxu2 %v386_v58 }
 0x16c   :  { %812 = vmatpush.bf16.msra.mxu3 %v701_v63 }
 0x170   :  { %813 = vmatpush.bf16.msra.mxu3 %v1349_v3 }
 0x174   :  { %814 = vmatpush.bf16.msra.mxu3 %v1337_v5 }
 0x17a   :  { %1363 = vmatmul.msk.bf16.vlgmr.msrb.gmra.mxu3 %vm116_vm1, %v388_v61  ;;  %789 = vmatmul.bf16.vlgmr.msra.gmra.mxu0 %v386_v58 }
 0x17b   :  { %763 = vmatmul.bf16.vlgmr.msra.gmra.mxu1 %v387_v59  ;;  %802 = vmatmul.bf16.vlgmr.msra.gmra.mxu2 %v387_v59 }
 0x18a   :  { %1364 = vmatmul.msk.bf16.vlgmr.msra.gmra.mxu3 %vm116_vm1, %v388_v61 }
 0x1e7   :  { %v725_v0 = vpop.f32.mrf.mxu0 }
 0x1e8   :  { %v738_v6 = vpop.f32.mrf.mxu1 }
 0x1ed   :  { %v712_v7 = vpop.f32.mrf.mxu3 }
 0x1ee   :  { %v726_v8 = vadd.f32 %v725_v0, %v712_v7  ;;  %v751_v10 = vpop.f32.mrf.mxu2 }
 0x1ef   :  { %v727_v62 = vpop.f32.mrf.mxu0 }
 0x1f0   :  { %v1987_v11 = vadd.f32 %v738_v6, %v726_v8  ;;  %v740_v12 = vpop.f32.mrf.mxu1 }
 0x1f2   :  { %v824_v13 = vrot.slane %v1987_v11, 4  ;;  %v846_v17 = vmul.f32 %v1987_v11, %v1987_v11 }
 0x1f4   :  { %v825_v18 = vadd.f32 %v824_v13, %v1987_v11  ;;  %v849_v24 = vrot.slane %v846_v17, 4 }
 0x1f5   :  { %v714_v27 = vpop.f32.mrf.mxu3 }
 0x1f6   :  { %v826_v42 = vrot.slane %v825_v18, 2  ;;  %v850_v19 = vadd.f32 %v849_v24, %v846_v17  ;;  %v753_v20 = vpop.f32.mrf.mxu2 }
 0x1f7   :  { %v790_v21 = vpop.f32.mrf.mxu0 }
 0x1f8   :  { %v827_v22 = vadd.f32 %v826_v42, %v825_v18  ;;  %v851_v23 = vrot.slane %v850_v19, 2  ;;  %v764_v25 = vpop.f32.mrf.mxu1 }
 0x1f9   :  { %v765_v29 = vadd.f32 %v764_v25, %v751_v10 }
 0x1fa   :  { %v828_v26 = vrot.slane %v827_v22, 1  ;;  %v852_v28 = vadd.f32 %v851_v23, %v850_v19 }
 0x1fc   :  { %v829_v34 = vadd.f32 %v828_v26, %v827_v22  ;;  %v853_v35 = vrot.slane %v852_v28, 1 }
 0x1fd   :  { %v777_v30 = vpop.f32.mrf.mxu3 }
 0x1fe   :  { %v1993_v31 = vadd.f32 %v777_v30, %v765_v29  ;;  %v803_v32 = vpop.f32.mrf.mxu2  ;;  %v854_v41 = vadd.f32 %v853_v35, %v852_v28  ;;  %v2000_v45 = vmul.f32 %v829_v34, %v1563_v51 }
 0x1ff   :  { %v792_v33 = vpop.f32.mrf.mxu0  ;;  %v804_v56 = vadd.f32 %v803_v32, %v790_v21 }
 0x200   :  { %v830_v36 = vrot.slane %v1993_v31, 4  ;;  %v847_v37 = vmul.f32 %v1993_v31, %v1993_v31  ;;  %v766_v38 = vpop.f32.mrf.mxu1  ;;  %v868_v15 = vmul.f32 %v854_v41, %v1563_v51  ;;  %v871_v9 = vmul.f32 %v2000_v45, %v2000_v45  ;;  %v1365_v41 = vld [vmem:[%s2059_s2 + $0x4] ss:$8 sm:$0x7] }
 0x202   :  { %v831_v39 = vadd.f32 %v830_v36, %v1993_v31  ;;  %v855_v40 = vrot.slane %v847_v37, 4  ;;  %v874_v57 = vsub.f32 %v868_v15, %v871_v9  ;;  %v916_v9 = vperm.slane %v1365_v41, 2 }
 0x204   :  { %v832_v43 = vrot.slane %v831_v39, 2  ;;  %v856_v44 = vadd.f32 %v855_v40, %v847_v37  ;;  %v877_v4 = vmax.f32 %v874_v57, 0.0 }
 0x205   :  { %v779_v46 = vpop.f32.mrf.mxu3 }
 0x206   :  { %v833_v14 = vadd.f32 %v832_v43, %v831_v39  ;;  %v857_v47 = vrot.slane %v856_v44, 2  ;;  %v805_v49 = vpop.f32.mrf.mxu2  ;;  %v880_v10 = vadd.f32 1e-05, %v877_v4 }
 0x208   :  { %v834_v48 = vrot.slane %v833_v14, 1  ;;  %v858_v16 = vadd.f32 %v857_v47, %v856_v44  ;;  %v915_v44 = vperm.slane %v1365_v41, 1  ;;  %vm889_vm8 = vweird.f32 %v880_v10 }
 0x20a   :  { %v835_v50 = vadd.f32 %v834_v48, %v833_v14  ;;  %v859_v52 = vrot.slane %v858_v16, 1 }
 0x20c   :  { %v2006_v53 = vmul.f32 %v835_v50, %v1563_v51  ;;  %v860_v54 = vadd.f32 %v859_v52, %v858_v16  ;;  %v914_v16 = vperm.slane %v1365_v41, 0 }
 0x20d   :  { %v816_v58 = vpop.f32.mrf.mxu3 }
 0x20e   :  { %v869_v59 = vmul.f32 %v860_v54, %v1563_v51  ;;  %v872_v61 = vmul.f32 %v2006_v53, %v2006_v53  ;;  %v2011_v63 = vadd.f32 %v816_v58, %v804_v56 }
 0x210   :  { %v875_v1 = vsub.f32 %v869_v59, %v872_v61  ;;  %v836_v2 = vsel %vm116_vm1, %v2011_v63, 0.0  ;;  %v848_v3 = vmul.f32 %v2011_v63, %v2011_v63 }
 0x211   :  { %v837_v55 = vrot.slane %v836_v2, 4 }
 0x212   :  { %v878_v5 = vmax.f32 %v875_v1, 0.0  ;;  %v861_v0 = vsel %vm116_vm1, %v848_v3, 0.0  ;;  %v1366_v3 = vld [vmem:[%s2059_s2 + $0x5] ss:$8 sm:$0x7] }
 0x213   :  { %v838_v6 = vadd.f32 %v837_v55, %v836_v2  ;;  %v862_v7 = vrot.slane %v861_v0, 4 }
 0x214   :  { %v881_v8 = vadd.f32 1e-05, %v878_v5 }
 0x215   :  { %v839_v62 = vrot.slane %v838_v6, 2  ;;  %v863_v12 = vadd.f32 %v862_v7, %v861_v0  ;;  %v818_v13 = vpop.f32.mrf.mxu3 }
 0x216   :  { %1449 = vrsqrt.f32 %v881_v8  ;;  %vm899_vm5 = vweird.f32 %v881_v8 }
 0x217   :  { %v840_v17 = vadd.f32 %v839_v62, %v838_v6  ;;  %v864_v18 = vrot.slane %v863_v12, 2  ;;  %1451 = vrsqrt.f32 %v880_v10 }
 0x219   :  { %v841_v24 = vrot.slane %v840_v17, 1  ;;  %v865_v27 = vadd.f32 %v864_v18, %v863_v12 }
 0x21b   :  { %v842_v42 = vadd.f32 %v841_v24, %v840_v17  ;;  %v866_v19 = vrot.slane %v865_v27, 1 }
 0x21c   :  { %v1450_v20 = vpop.eup %1449 }
 0x21d   :  { %v845_v21 = vmul.f32 %v842_v42, %v1563_v51  ;;  %v867_v22 = vadd.f32 %v866_v19, %v865_v27  ;;  %v894_v23 = vmul.f32 %v1450_v20, %v881_v8  ;;  %v1452_v25 = vpop.eup %1451  ;;  %vm900_vm4 = vweird.f32 %v1450_v20 }
 0x21e   :  { %v884_v32 = vmul.f32 %v1452_v25, %v880_v10  ;;  %vm901_vm6 = vmor %vm899_vm5, %vm900_vm4  ;;  %vm890_vm7 = vweird.f32 %v1452_v25 }
 0x21f   :  { %v870_v26 = vmul.f32 %v867_v22, %v1563_v51  ;;  %v873_v28 = vmul.f32 %v845_v21, %v845_v21  ;;  %v895_v29 = vmul.f32 %v1450_v20, %v894_v23  ;;  %vm891_vm10 = vmor %vm889_vm8, %vm890_vm7  ;;  %v1013_v23 = vld [vmem:[%s2058_s1 + $0x1f8] sm:$0xff] }
 0x220   :  { %v885_v36 = vmul.f32 %v1452_v25, %v884_v32 }
 0x221   :  { %v876_v30 = vsub.f32 %v870_v26, %v873_v28  ;;  %v896_v34 = vmul.f32 0.5, %v895_v29  ;;  %v1015_v26 = vunpack.c.l.bf16 %v1013_v23 }
 0x222   :  { %v886_v38 = vmul.f32 0.5, %v885_v36 }
 0x223   :  { %v879_v33 = vmax.f32 %v876_v30, 0.0  ;;  %v897_v37 = vsub.f32 1.5, %v896_v34  ;;  %1040 = vmatpush.xpose.msrb.mxu1 %v1015_v26 }
 0x224   :  { %v887_v43 = vsub.f32 1.5, %v886_v38 }
 0x225   :  { %v882_v35 = vadd.f32 1e-05, %v879_v33  ;;  %v898_v39 = vmul.f32 %v1450_v20, %v897_v37 }
 0x226   :  { %v888_v47 = vmul.f32 %v1452_v25, %v887_v43 }
 0x227   :  { %1453 = vrsqrt.f32 %v882_v35  ;;  %v902_v46 = vsel %vm901_vm6, %v1450_v20, %v898_v39  ;;  %vm909_vm11 = vweird.f32 %v882_v35 }
 0x228   :  { %v921_v15 = vmul.f32 %v915_v44, %v902_v46  ;;  %v892_v50 = vsel %vm891_vm10, %v1452_v25, %v888_v47  ;;  %v1014_v25 = vld [vmem:[%s2058_s1 + $0x200] sm:$0xf] }
 0x229   :  { %v920_v57 = vmul.f32 %v914_v16, %v892_v50  ;;  %v1017_v28 = vunpack.c.l.bf16 %v1014_v25 }
 0x22a   :  { %v924_v54 = vmul.f32 %v921_v15, %v2006_v53  ;;  %v936_v55 = vperm.slane %v921_v15, 0 }
 0x22b   :  { %v923_v1 = vmul.f32 %v920_v57, %v2000_v45  ;;  %v935_v4 = vperm.slane %v920_v57, 0  ;;  %1369 = vmatpush.xpose.msk.msrb.mxu3 %vm116_vm1, %v1017_v28 }
 0x22c   :  { %v929_v59 = vrot.slane %v924_v54, 7  ;;  %v939_v8 = vmul.f32 %v936_v55, %v1993_v31 }
 0x22d   :  { %v1454_v40 = vpop.eup %1453  ;;  %v938_v7 = vmul.f32 %v935_v4, %v1987_v11 }
 0x22e   :  { %v904_v51 = vmul.f32 %v1454_v40, %v882_v35  ;;  %vm910_vm9 = vweird.f32 %v1454_v40  ;;  %v931_v0 = vsel %vm219_vm12, %v923_v1, %v929_v59  ;;  %v1016_v35 = vunpack.c.h.bf16 %v1013_v23 }
 0x22f   :  { %vm911_vm14 = vmor %vm909_vm11, %vm910_vm9 }
 0x230   :  { %v905_v14 = vmul.f32 %v1454_v40, %v904_v51  ;;  %1060 = vmatpush.xpose.msra.mxu1 %v1016_v35  ;;  %v1367_v51 = vld [vmem:[%s2059_s2 + $0x6] ss:$8 sm:$0x7] }
 0x231   :  { %v991_v47 = vperm.slane %v1367_v51, 0 }
 0x232   :  { %v906_v49 = vmul.f32 0.5, %v905_v14 }
 0x234   :  { %v907_v48 = vsub.f32 1.5, %v906_v49  ;;  %v993_v49 = vperm.slane %v1367_v51, 2 }
 0x236   :  { %v908_v52 = vmul.f32 %v1454_v40, %v907_v48 }
 0x238   :  { %v912_v56 = vsel %vm911_vm14, %v1454_v40, %v908_v52 }
 0x239   :  { %v922_v58 = vmul.f32 %v916_v9, %v912_v56 }
 0x23b   :  { %v925_v61 = vmul.f32 %v922_v58, %v845_v21  ;;  %v937_v5 = vperm.slane %v922_v58, 0  ;;  %v992_v58 = vperm.slane %v1367_v51, 1 }
 0x23d   :  { %v930_v2 = vrot.slane %v925_v61, 6  ;;  %v940_v10 = vmul.f32 %v937_v5, %v2011_v63 }
 0x23f   :  { %v932_v53 = vsel %vm221_vm13, %v931_v0, %v930_v2 }
 0x240   :  { %v934_v6 = vsub.f32 %v1366_v3, %v932_v53  ;;  %v1018_v53 = vld [vmem:[%s2059_s2 + $0x18] ss:$0 sm:$0xff] }
 0x242   :  { %v942_v45 = vperm.slane %v934_v6, 0  ;;  %v943_v62 = vperm.slane %v934_v6, 1  ;;  %v944_v12 = vperm.slane %v934_v6, 2 }
 0x244   :  { %v948_v13 = vadd.f32 %v942_v45, %v938_v7  ;;  %v949_v17 = vadd.f32 %v943_v62, %v939_v8  ;;  %v950_v18 = vadd.f32 %v944_v12, %v940_v10 }
 0x246   :  { %v955_v24 = vadd.f32 %v949_v17, %v948_v13  ;;  %v956_v27 = vsel %vm116_vm1, %v950_v18, 0.0  ;;  %v961_v19 = vmul.f32 %v948_v13, %v948_v13  ;;  %v962_v20 = vmul.f32 %v949_v17, %v949_v17 }
 0x247   :  { %v963_v21 = vmul.f32 %v950_v18, %v950_v18 }
 0x248   :  { %v957_v42 = vadd.f32 %v956_v27, %v955_v24  ;;  %v964_v22 = vadd.f32 %v962_v20, %v961_v19 }
 0x249   :  { %v965_v11 = vsel %vm116_vm1, %v963_v21, 0.0 }
 0x24a   :  { %958 = vadd.xlane.f32.xlu1 %v957_v42  ;;  %v966_v31 = vadd.f32 %v965_v11, %v964_v22 }
 0x252   :  { %967 = vadd.xlane.f32.xlu1 %v966_v31 }
 0x2bd   :  { %v959_v63 = vpop.xlane.xlu1 %958 }
 0x2be   :  { %v960_v29 = vmul.f32 %v959_v63, %v1786_v60 }
 0x2c0   :  { %v970_v32 = vmul.f32 %v960_v29, %v960_v29  ;;  %v973_v46 = vsub.f32 %v948_v13, %v960_v29  ;;  %v975_v14 = vsub.f32 %v950_v18, %v960_v29  ;;  %v974_v15 = vsub.f32 %v949_v17, %v960_v29 }
 0x2c5   :  { %v968_v30 = vpop.xlane.xlu1 %967 }
 0x2c6   :  { %v969_v33 = vmul.f32 %v968_v30, %v1786_v60  ;;  %v1368_v60 = vld [vmem:[%s2059_s2 + $0x7] ss:$8 sm:$0x7] }
 0x2c7   :  { %v1001_v50 = vperm.slane %v1368_v60, 0  ;;  %v1003_v52 = vperm.slane %v1368_v60, 2  ;;  %v1002_v4 = vperm.slane %v1368_v60, 1 }
 0x2c8   :  { %v971_v34 = vsub.f32 %v969_v33, %v970_v32 }
 0x2ca   :  { %v972_v36 = vmax.f32 %v971_v34, 0.0 }
 0x2cc   :  { %v976_v37 = vadd.f32 1e-05, %v972_v36 }
 0x2ce   :  { %1455 = vrsqrt.f32 %v976_v37  ;;  %vm983_vm13 = vweird.f32 %v976_v37 }
 0x2d4   :  { %v1456_v38 = vpop.eup %1455 }
 0x2d5   :  { %v978_v39 = vmul.f32 %v1456_v38, %v976_v37  ;;  %vm984_vm12 = vweird.f32 %v1456_v38 }
 0x2d6   :  { %vm985_vm15 = vmor %vm983_vm13, %vm984_vm12 }
 0x2d7   :  { %v979_v40 = vmul.f32 %v1456_v38, %v978_v39 }
 0x2d9   :  { %v980_v41 = vmul.f32 0.5, %v979_v40 }
 0x2db   :  { %v981_v43 = vsub.f32 1.5, %v980_v41 }
 0x2dd   :  { %v982_v44 = vmul.f32 %v1456_v38, %v981_v43 }
 0x2df   :  { %v986_v48 = vsel %vm985_vm15, %v1456_v38, %v982_v44 }
 0x2e0   :  { %v989_v16 = vmul.f32 %v986_v48, %v975_v14  ;;  %v987_v9 = vmul.f32 %v986_v48, %v973_v46  ;;  %v988_v57 = vmul.f32 %v986_v48, %v974_v15 }
 0x2e2   :  { %v997_v54 = vmul.f32 %v991_v47, %v987_v9  ;;  %v999_v56 = vmul.f32 %v993_v49, %v989_v16  ;;  %v998_v3 = vmul.f32 %v992_v58, %v988_v57 }
 0x2e4   :  { %v1007_v59 = vadd.f32 %v1001_v50, %v997_v54  ;;  %v1009_v61 = vadd.f32 %v1003_v52, %v999_v56  ;;  %v1008_v55 = vadd.f32 %v1002_v4, %v998_v3 }
 0x2e6   :  { %v1010_v1 = vmax.f32 %v1007_v59, 0.0  ;;  %v1012_v2 = vmax.f32 %v1009_v61, 0.0  ;;  %v1011_v5 = vmax.f32 %v1008_v55, 0.0 }
 0x2e8   :  { %1041 = vmatmul.f32.vlgmr.msrb.gmra.mxu1 %v1010_v1  ;;  %1370 = vmatmul.msk.f32.vlgmr.msrb.gmra.mxu3 %vm116_vm1, %v1012_v2  ;;  %vm1086_vm1 = vcmask 64512  }
 0x2f0   :  { %1061 = vmatmul.f32.vlgmr.msra.gmra.mxu1 %v1011_v5 }
 0x365   :  { %v1042_v0 = vpop.f32.mrf.mxu1 }
 0x366   :  { %v1043_v6 = vadd.f32 %v1042_v0, %v1018_v53 }
 0x36b   :  { %v1082_v10 = vpop.f32.mrf.mxu3 }
 0x36d   :  { %v1062_v7 = vpop.f32.mrf.mxu1 }
 0x36e   :  { %v1063_v8 = vadd.f32 %v1062_v7, %v1043_v6 }
 0x370   :  { %v1083_v45 = vadd.f32 %v1082_v10, %v1063_v8 }
 0x372   :  { %v1085_v62 = vmax.f32 %v1083_v45, 0.0 }
 0x374   :  { %1087 = vst.msk [vmem:[#allocation2] sm:$0xff] %vm1086_vm1, %v1085_v62 }
 0x375   :  { %1098 = dma.vmem_to_hbm [thread:$0]  %s1094_s9, 128, %s1096_s11, [#allocation3]  }
 0x376   :  { %1481 = dma.done.wait [#allocation3], 128  }
 0x377   :  { %1482 = vsyncadd [#allocation3], 4294967168 }
 0x378   :  { %1103 = vsyncpa [#allocation3], 1 }

</bundles_post_ra>
